<compile_context>
chip_gen: v5e
topology: v5e:2x2
jax: 0.10.0
libtpu: 0.0.40
codegen_flags: <defaults>
</compile_context>

<pallas_src>
import functools
import numpy as np

import jax
import jax.numpy as jnp
from jax.experimental import pallas as pl
from jax.experimental.pallas import tpu as pltpu

EPS = 1e-5                                # LayerNorm / InstanceNorm eps (PyTorch default)
MATMUL_INPUT_DTYPE = jnp.bfloat16         # MXU operand dtype (f32 accumulation)
STORE_DTYPE = jnp.bfloat16                # inter-kernel intermediates in HBM


def _vmem_capacity_bytes():
    try:
        return int(pltpu.get_tpu_info().vmem_capacity_bytes)
    except Exception:  # pragma: no cover - conservative fallback (v7x per-TC VMEM)
        return 64 * 1024 * 1024


_VMEM_CAP = _vmem_capacity_bytes()
_VMEM_LIMIT = min(int(0.7 * _VMEM_CAP), 96 * 1024 * 1024)
_SLAB_BUDGET = min(_VMEM_CAP // 5, 24 * 1024 * 1024)
_WINDOW_BUDGET = min(_VMEM_CAP // 8, 12 * 1024 * 1024)


# ---------------------------------------------------------------- helpers ----
def _gelu(x):
    # exact (erf-based) GELU == nn.GELU() default
    return 0.5 * x * (1.0 + jax.lax.erf(x * (1.0 / np.sqrt(2.0))))


def _layernorm(y, gamma, beta):
    m = jnp.mean(y, axis=-1, keepdims=True)
    v = jnp.mean((y - m) ** 2, axis=-1, keepdims=True)
    return (y - m) * jax.lax.rsqrt(v + EPS) * gamma + beta


def _mm(a, b):
    # MXU matmul: bf16 operands, f32 accumulation (elementwise math stays f32)
    return jnp.dot(a.astype(MATMUL_INPUT_DTYPE), b.astype(MATMUL_INPUT_DTYPE),
                   preferred_element_type=jnp.float32)


def _row_tile(rows, target=1024):
    if rows <= 8:
        return rows
    return min(target, (rows // 8) * 8)


def _pick_chunk(total, target=1024):
    # largest divisor of `total` (multiple of 8, or the full extent) <= target
    cands = [c for c in range(1, total + 1)
             if total % c == 0 and (c % 8 == 0 or c == total)]
    feas = [c for c in cands if c <= target]
    return max(feas) if feas else total


def _pick_slab_depth(D, H, W, Hp, Wp, C, pad, budget_bytes):
    # largest divisor SD of D whose per-step conv buffers fit the VMEM budget
    # TODO(synk): allow a ragged last slab for prime D (currently degrades to SD=1).
    cands = [sd for sd in range(1, D + 1)
             if D % sd == 0 and ((sd * H * W) % 8 == 0 or sd == D)]

    def cost(sd):
        slab = (sd + 2 * pad) * Hp * Wp * C
        body = sd * H * W * C
        return (slab * 2 * 2          # double-buffered bf16 slab scratch
                + slab * 4            # one f32 upcast of the slab
                + body * 4 * 2        # f32 conv accumulator + live tap temp
                + body * 2 * 2)       # pipelined bf16 output block
    feas = [sd for sd in cands if cost(sd) <= budget_bytes]
    return max(feas) if feas else min(cands)


def _pick_window_block(nW, N, num_heads, attn_dim, budget_bytes):
    # WB must divide nW so every attention block stays inside one batch (shared gate)
    def cost(wb):
        return (wb * N * attn_dim * 2 * 4      # in/out blocks (bf16, double-buffered)
                + wb * N * 3 * attn_dim * 4    # f32 qkv
                + 3 * wb * N * N * 4           # score / prob temporaries
                + 4 * wb * N * attn_dim * 4)   # per-head q/k/v/out f32 temporaries
    cands = [wb for wb in range(1, nW + 1) if nW % wb == 0 and cost(wb) <= budget_bytes]
    return max(cands) if cands else 1


# ---------------------------------------------------------------- kernels ----
def _proj_fused_kernel(x_ref, wpa_ref, bpa_ref, gpa_ref, bepa_ref,
                       wpc_ref, bpc_ref, gpc_ref, bepc_ref, oa_ref, oc_ref):
    # fused proj_attn(+LayerNorm) and proj_cnn(+LayerNorm): the x tile is read once.
    x = x_ref[...]
    ya = _mm(x, wpa_ref[...]) + bpa_ref[...]
    oa_ref[...] = _layernorm(ya, gpa_ref[...], bepa_ref[...]).astype(oa_ref.dtype)
    yc = _mm(x, wpc_ref[...]) + bpc_ref[...]
    oc_ref[...] = _layernorm(yc, gpc_ref[...], bepc_ref[...]).astype(oc_ref.dtype)


def _dwconv_pass1_kernel(x_hbm, w_ref, out_ref, sum_ref, ssq_ref,
                         slab_ref, dma_sem, *, ksize, SD, H, W, Dp):
    # depthwise Conv3d on one depth slab.  The halo'd slab is DMA'd manually from HBM
    # with double buffering (prefetch slab s+1 while computing slab s; priming is
    # per-batch so megacore sharding of the batch axis is safe).  Per-slab sum /
    # sum-of-squares accumulators feed the two-pass InstanceNorm3d.
    b = pl.program_id(0)
    s = pl.program_id(1)
    n_s = pl.num_programs(1)
    pad = ksize // 2
    slab_d = SD + 2 * pad
    slot = s % 2

    def fetch(ss, slot_):
        start = b * Dp + ss * SD
        pltpu.make_async_copy(x_hbm.at[pl.ds(start, slab_d)],
                              slab_ref.at[slot_], dma_sem.at[slot_]).start()

    @pl.when(s == 0)
    def _():
        fetch(0, 0)                                  # prime first slab of this batch

    @pl.when(s + 1 < n_s)
    def _():
        fetch(s + 1, 1 - slot)                       # prefetch next slab

    pltpu.make_async_copy(x_hbm.at[pl.ds(0, slab_d)],
                          slab_ref.at[slot], dma_sem.at[slot]).wait()

    x = slab_ref[slot].astype(jnp.float32)           # (SD+2p, Hp, Wp, C)
    C = x.shape[-1]
    acc = jnp.zeros((SD, H, W, C), jnp.float32)
    for kd in range(ksize):                          # static 27-tap unroll
        for kh in range(ksize):
            for kw in range(ksize):
                acc = acc + x[kd:kd + SD, kh:kh + H, kw:kw + W, :] * w_ref[kd, kh, kw]
    # NOTE: the Conv3d bias is omitted — InstanceNorm3d(affine=False) cancels it exactly.
    y = acc.reshape(SD * H * W, C)
    out_ref[0] = y.astype(out_ref.dtype)

    @pl.when(s == 0)
    def _():
        sum_ref[...] = jnp.zeros_like(sum_ref)
        ssq_ref[...] = jnp.zeros_like(ssq_ref)
    sum_ref[0] += jnp.sum(y, axis=0, keepdims=True)
    ssq_ref[0] += jnp.sum(y * y, axis=0, keepdims=True)


def _dwconv_pass2_kernel(y_ref, m_ref, v_ref, wp_ref, bp_ref, proj_ref, pool_ref):
    # InstanceNorm (precomputed per-batch stats) + GELU, fused with the 1x1x1 projection
    # (dim -> dim/2) and the global-average-pool partial sums.
    s = pl.program_id(1)
    y = y_ref[0].astype(jnp.float32)                  # (rows, dim)
    yn = _gelu((y - m_ref[0]) * jax.lax.rsqrt(v_ref[0] + EPS))

    @pl.when(s == 0)
    def _():
        pool_ref[...] = jnp.zeros_like(pool_ref)
    pool_ref[0] += jnp.sum(yn, axis=0, keepdims=True)
    proj_ref[0] = (_mm(yn, wp_ref[...]) + bp_ref[...]).astype(proj_ref.dtype)


def _channel_interaction_kernel(p_ref, w1_ref, b1_ref, w2_ref, b2_ref, o_ref):
    # Conv3d(dim->dim/8,1) -> GELU -> Conv3d(dim/8->dim/2,1) on the pooled 1x1x1 feature
    h = _gelu(_mm(p_ref[...], w1_ref[...]) + b1_ref[...])
    o_ref[...] = (_mm(h, w2_ref[...]) + b2_ref[...]).astype(o_ref.dtype)


def _attention_kernel(x_ref, wqkv_ref, bqkv_ref, bias_ref, gate_ref, o_ref,
                      *, num_heads, head_dim, wb):
    # WB windows per grid step: one big QKV matmul, then window-batched attention per
    # head (static unroll over the small head count).  The qk scale is pre-folded into
    # the q columns of wqkv/bqkv; softmax normalization uses the EUP approx reciprocal.
    n = x_ref.shape[1]
    C = num_heads * head_dim
    x = x_ref[...].reshape(wb * n, C)
    qkv = _mm(x, wqkv_ref[...]) + bqkv_ref[...]                  # (wb*n, 3C) f32
    gate = jax.nn.sigmoid(gate_ref[...].astype(jnp.float32)).reshape(1, C)
    bias = bias_ref[...]                                         # (num_heads, n, n)
    outs = []
    for h in range(num_heads):
        lo = h * head_dim
        qh = qkv[:, lo:lo + head_dim].reshape(wb, n, head_dim)
        kh = qkv[:, C + lo:C + lo + head_dim].reshape(wb, n, head_dim)
        vh = (qkv[:, 2 * C + lo:2 * C + lo + head_dim]
              * gate[:, lo:lo + head_dim]).reshape(wb, n, head_dim)
        s = jnp.einsum("bnd,bmd->bnm", qh.astype(MATMUL_INPUT_DTYPE),
                       kh.astype(MATMUL_INPUT_DTYPE),
                       preferred_element_type=jnp.float32)
        s = s + bias[h][None]
        s = s - jnp.max(s, axis=-1, keepdims=True)
        p = jnp.exp(s)
        p = p * pl.reciprocal(jnp.sum(p, axis=-1, keepdims=True), approx=True)
        oh = jnp.einsum("bnm,bmd->bnd", p.astype(MATMUL_INPUT_DTYPE),
                        vh.astype(MATMUL_INPUT_DTYPE),
                        preferred_element_type=jnp.float32)
        outs.append(oh)                                          # head-major channels
    o = outs[0] if num_heads == 1 else jnp.concatenate(outs, axis=-1)
    o_ref[...] = o.astype(o_ref.dtype)                           # single dense store


def _spatial_pass1_kernel(xa_ref, w1_ref, b1_ref, h1_ref, sum_ref, ssq_ref):
    # spatial_interaction first 1x1 conv + stats for its InstanceNorm (pass 1 of 2).
    j = pl.program_id(1)
    h = _mm(xa_ref[0], w1_ref[...]) + b1_ref[...]                # (TS, dim//16) f32
    h1_ref[0] = h.astype(h1_ref.dtype)

    @pl.when(j == 0)
    def _():
        sum_ref[...] = jnp.zeros_like(sum_ref)
        ssq_ref[...] = jnp.zeros_like(ssq_ref)
    sum_ref[0] += jnp.sum(h, axis=0, keepdims=True)
    ssq_ref[0] += jnp.sum(h * h, axis=0, keepdims=True)


def _spatial_pass2_kernel(h1_ref, m1_ref, v1_ref, xc_ref, w2_ref, b2_ref,
                          y_ref, sum_ref, ssq_ref):
    # InstanceNorm + GELU + second 1x1 conv -> sigmoid gate, applied to the projected
    # cnn branch, plus the conv_norm (InstanceNorm3d) sum/sumsq accumulators.
    j = pl.program_id(1)
    h = (h1_ref[0].astype(jnp.float32) - m1_ref[0]) * jax.lax.rsqrt(v1_ref[0] + EPS)
    h = _gelu(h)
    gate = jax.nn.sigmoid(jnp.sum(h * w2_ref[...], axis=-1, keepdims=True) + b2_ref[...])
    y = gate * xc_ref[0].astype(jnp.float32)                     # (TS, attn_dim)
    y_ref[0] = y.astype(y_ref.dtype)

    @pl.when(j == 0)
    def _():
        sum_ref[...] = jnp.zeros_like(sum_ref)
        ssq_ref[...] = jnp.zeros_like(ssq_ref)
    sum_ref[0] += jnp.sum(y, axis=0, keepdims=True)
    ssq_ref[0] += jnp.sum(y * y, axis=0, keepdims=True)


def _final_kernel(xa_ref, g_ref, be_ref, y_ref, my_ref, vy_ref,
                  wa_ref, wc_ref, b_ref, o_ref):
    # attn_norm(LayerNorm) + conv_norm(InstanceNorm, precomputed stats) + split-weight
    # final projection (a@W[:C] + c@W[C:]) — no concat is materialized.
    a = _layernorm(xa_ref[0].astype(jnp.float32), g_ref[...], be_ref[...])
    c = (y_ref[0].astype(jnp.float32) - my_ref[0]) * jax.lax.rsqrt(vy_ref[0] + EPS)
    o_ref[0] = (_mm(a, wa_ref[...]) + _mm(c, wc_ref[...]) + b_ref[...]).astype(o_ref.dtype)


# ------------------------------------------------------------------- glue ----
def _windows_to_volume(x_win, B, D, H, W, ws):
    wd, wh, ww = ws
    d, h, w = D // wd, H // wh, W // ww
    C = x_win.shape[-1]
    x = x_win.reshape(B, d, h, w, wd, wh, ww, C)
    x = x.transpose(0, 1, 4, 2, 5, 3, 6, 7)
    return x.reshape(B, D, H, W, C)


def _volume_to_windows(x, ws):
    B, D, H, W, C = x.shape
    wd, wh, ww = ws
    d, h, w = D // wd, H // wh, W // ww
    x = x.reshape(B, d, wd, h, wh, w, ww, C)
    x = x.transpose(0, 1, 3, 5, 2, 4, 6, 7)
    return x.reshape(B * d * h * w, wd * wh * ww, C)


def _relative_position_index(ws):
    wd, wh, ww = ws
    coords = np.stack(np.meshgrid(np.arange(wd), np.arange(wh), np.arange(ww), indexing="ij"))
    coords_flatten = coords.reshape(3, -1)                            # (3, N)
    rel = coords_flatten[:, :, None] - coords_flatten[:, None, :]     # (3, N, N)
    rel = rel.transpose(1, 2, 0).astype(np.int64)                     # (N, N, 3)
    rel[..., 0] += wd - 1
    rel[..., 1] += wh - 1
    rel[..., 2] += ww - 1
    rel[..., 0] *= (2 * wh - 1) * (2 * ww - 1)
    rel[..., 1] *= (2 * ww - 1)
    return rel.sum(-1)                                                # (N, N)


def make_params(key, dim, window_size, num_heads, ksize):
    attn_dim = dim // 2
    wd, wh, ww = window_size
    N = wd * wh * ww
    ks = jax.random.split(key, 24)

    def nrm(k, shape, s=0.02):
        return jax.random.normal(k, shape, jnp.float32) * s

    params = dict(
        w_pa=nrm(ks[0], (dim, attn_dim)), b_pa=nrm(ks[1], (1, attn_dim)),
        g_pa=jnp.ones((1, attn_dim), jnp.float32), be_pa=jnp.zeros((1, attn_dim), jnp.float32),
        w_pc=nrm(ks[2], (dim, dim)), b_pc=nrm(ks[3], (1, dim)),
        g_pc=jnp.ones((1, dim), jnp.float32), be_pc=jnp.zeros((1, dim), jnp.float32),
        w_dw=nrm(ks[4], (ksize, ksize, ksize, dim)),
        # b_dw exists in the PyTorch module but InstanceNorm3d(affine=False) cancels it
        # exactly, so no kernel consumes it.
        b_dw=nrm(ks[5], (1, dim)),
        w_ci1=nrm(ks[6], (dim, dim // 8)), b_ci1=nrm(ks[7], (1, dim // 8)),
        w_ci2=nrm(ks[8], (dim // 8, attn_dim)), b_ci2=nrm(ks[9], (1, attn_dim)),
        w_proj_c=nrm(ks[10], (dim, attn_dim)), b_proj_c=nrm(ks[11], (1, attn_dim)),
        w_qkv=nrm(ks[12], (attn_dim, 3 * attn_dim)), b_qkv=nrm(ks[13], (1, 3 * attn_dim)),
        w_si1=nrm(ks[14], (attn_dim, dim // 16)), b_si1=nrm(ks[15], (1, dim // 16)),
        w_si2=nrm(ks[16], (1, dim // 16)), b_si2=nrm(ks[17], (1, 1)),
        g_an=jnp.ones((1, attn_dim), jnp.float32), be_an=jnp.zeros((1, attn_dim), jnp.float32),
        w_proj=nrm(ks[18], (dim, dim)), b_proj=nrm(ks[19], (1, dim)),
    )
    table = nrm(ks[20], ((2 * wd - 1) * (2 * wh - 1) * (2 * ww - 1), num_heads))
    idx = _relative_position_index(window_size)
    rel_bias = table[idx.reshape(-1)].reshape(N, N, num_heads).transpose(2, 0, 1)
    params["rel_bias"] = jnp.asarray(rel_bias, jnp.float32)           # (num_heads, N, N)
    return params


# --------------------------------------------------------------- forward -----
def mixing_attention_forward(params, x, D, H, W, *, window_size, num_heads, ksize, mask=None):
    assert mask is None  # TODO(synk): shifted-window mask branch not implemented
    B_, N, dim = x.shape
    attn_dim = dim // 2
    head_dim = attn_dim // num_heads
    scale = head_dim ** -0.5
    wd, wh, ww = window_size
    nW = (D // wd) * (H // wh) * (W // ww)
    B = B_ // nW
    S = D * H * W
    R = B_ * N
    f32 = jnp.float32
    bf = MATMUL_INPUT_DTYPE
    st = STORE_DTYPE

    row_par = pltpu.CompilerParams(dimension_semantics=("parallel",),
                                   vmem_limit_bytes=_VMEM_LIMIT)
    slab_par = pltpu.CompilerParams(dimension_semantics=("parallel", "arbitrary"),
                                    vmem_limit_bytes=_VMEM_LIMIT)

    # ---- pre-cast resident matmul weights once (MXU operand dtype) ------------
    w_pa = params["w_pa"].astype(bf)
    w_pc = params["w_pc"].astype(bf)
    w_proj_c = params["w_proj_c"].astype(bf)
    w_ci1 = params["w_ci1"].astype(bf)
    w_ci2 = params["w_ci2"].astype(bf)
    w_si1 = params["w_si1"].astype(bf)
    w_out_a = params["w_proj"][:attn_dim].astype(bf)
    w_out_c = params["w_proj"][attn_dim:].astype(bf)
    col_scale = jnp.concatenate([jnp.full((attn_dim,), scale, f32),
                                 jnp.ones((2 * attn_dim,), f32)])[None, :]
    w_qkv_s = (params["w_qkv"] * col_scale).astype(bf)   # fold 1/sqrt(head_dim) into q
    b_qkv_s = params["b_qkv"] * col_scale

    # ---- fused proj_attn(+LN) / proj_cnn(+LN): x read from HBM once -----------
    x2d = x.reshape(R, dim)
    tm = _row_tile(R, 1024)
    grid_r = pl.cdiv(R, tm)
    x_atten, x_cnn_win = pl.pallas_call(
        _proj_fused_kernel,
        grid=(grid_r,),
        in_specs=[
            pl.BlockSpec((tm, dim), lambda i: (i, 0)),
            pl.BlockSpec((dim, attn_dim), lambda i: (0, 0)),
            pl.BlockSpec((1, attn_dim), lambda i: (0, 0)),
            pl.BlockSpec((1, attn_dim), lambda i: (0, 0)),
            pl.BlockSpec((1, attn_dim), lambda i: (0, 0)),
            pl.BlockSpec((dim, dim), lambda i: (0, 0)),
            pl.BlockSpec((1, dim), lambda i: (0, 0)),
            pl.BlockSpec((1, dim), lambda i: (0, 0)),
            pl.BlockSpec((1, dim), lambda i: (0, 0)),
        ],
        out_specs=[
            pl.BlockSpec((tm, attn_dim), lambda i: (i, 0)),
            pl.BlockSpec((tm, dim), lambda i: (i, 0)),
        ],
        out_shape=[
            jax.ShapeDtypeStruct((R, attn_dim), st),
            jax.ShapeDtypeStruct((R, dim), st),
        ],
        compiler_params=row_par,
    )(x2d, w_pa, params["b_pa"], params["g_pa"], params["be_pa"],
      w_pc, params["b_pc"], params["g_pc"], params["be_pc"])

    # ---- depthwise conv path: double-buffered slab DMA, two-pass InstanceNorm --
    x_cnn_vol = _windows_to_volume(x_cnn_win.reshape(B_, N, dim), B, D, H, W, window_size)
    pad = ksize // 2
    # TODO(synk): fold the zero padding / window->volume remap into the slab DMA itself.
    x_pad = jnp.pad(x_cnn_vol, ((0, 0), (pad, pad), (pad, pad), (pad, pad), (0, 0)))
    Dp, Hp, Wp = D + 2 * pad, H + 2 * pad, W + 2 * pad
    x_pad_flat = x_pad.reshape(B * Dp, Hp, Wp, dim)

    SD = _pick_slab_depth(D, H, W, Hp, Wp, dim, pad, _SLAB_BUDGET)
    n_slabs = D // SD
    rows_slab = SD * H * W

    conv_out, csum, cssq = pl.pallas_call(
        functools.partial(_dwconv_pass1_kernel, ksize=ksize, SD=SD, H=H, W=W, Dp=Dp),
        grid=(B, n_slabs),
        in_specs=[
            pl.BlockSpec(memory_space=pl.ANY),                  # raw HBM; manual slab DMA
            pl.BlockSpec((ksize, ksize, ksize, dim), lambda b, s: (0, 0, 0, 0)),
        ],
        out_specs=[
            pl.BlockSpec((1, rows_slab, dim), lambda b, s: (b, s, 0)),
            pl.BlockSpec((1, 1, dim), lambda b, s: (b, 0, 0)),
            pl.BlockSpec((1, 1, dim), lambda b, s: (b, 0, 0)),
        ],
        out_shape=[
            jax.ShapeDtypeStruct((B, S, dim), st),
            jax.ShapeDtypeStruct((B, 1, dim), f32),
            jax.ShapeDtypeStruct((B, 1, dim), f32),
        ],
        scratch_shapes=[
            pltpu.VMEM((2, SD + 2 * pad, Hp, Wp, dim), st),     # double-buffered slab
            pltpu.SemaphoreType.DMA((2,)),
        ],
        compiler_params=slab_par,
    )(x_pad_flat, params["w_dw"])

    mean_c = csum / float(S)                                            # (B, 1, dim)
    var_c = jnp.maximum(cssq / float(S) - mean_c * mean_c, 0.0)         # biased var

    x_cnn_proj, pool_sum = pl.pallas_call(
        _dwconv_pass2_kernel,
        grid=(B, n_slabs),
        in_specs=[
            pl.BlockSpec((1, rows_slab, dim), lambda b, s: (b, s, 0)),
            pl.BlockSpec((1, 1, dim), lambda b, s: (b, 0, 0)),
            pl.BlockSpec((1, 1, dim), lambda b, s: (b, 0, 0)),
            pl.BlockSpec((dim, attn_dim), lambda b, s: (0, 0)),
            pl.BlockSpec((1, attn_dim), lambda b, s: (0, 0)),
        ],
        out_specs=[
            pl.BlockSpec((1, rows_slab, attn_dim), lambda b, s: (b, s, 0)),
            pl.BlockSpec((1, 1, dim), lambda b, s: (b, 0, 0)),
        ],
        out_shape=[
            jax.ShapeDtypeStruct((B, S, attn_dim), st),
            jax.ShapeDtypeStruct((B, 1, dim), f32),
        ],
        compiler_params=slab_par,
    )(conv_out, mean_c, var_c, w_proj_c, params["b_proj_c"])

    pooled = pool_sum[:, 0, :] / float(S)      # adaptive_avg_pool3d(dwconv3x3(x), 1)

    # ---- channel_interaction on the pooled feature (two 1x1x1 convs + GELU) ---
    tb = _row_tile(B, 256)
    ci = pl.pallas_call(
        _channel_interaction_kernel,
        grid=(pl.cdiv(B, tb),),
        in_specs=[
            pl.BlockSpec((tb, dim), lambda i: (i, 0)),
            pl.BlockSpec((dim, dim // 8), lambda i: (0, 0)),
            pl.BlockSpec((1, dim // 8), lambda i: (0, 0)),
            pl.BlockSpec((dim // 8, attn_dim), lambda i: (0, 0)),
            pl.BlockSpec((1, attn_dim), lambda i: (0, 0)),
        ],
        out_specs=pl.BlockSpec((tb, attn_dim), lambda i: (i, 0)),
        out_shape=jax.ShapeDtypeStruct((B, attn_dim), f32),
        compiler_params=row_par,
    )(pooled, w_ci1, params["b_ci1"], w_ci2, params["b_ci2"])

    # ---- window attention (WB windows per grid step, channel-gated v) ---------
    WB = _pick_window_block(nW, N, num_heads, attn_dim, _WINDOW_BUDGET)
    bpb = nW // WB                                     # grid steps per batch element
    gate3 = ci.reshape(B, 1, attn_dim)                 # per-batch gate via index_map

    attn_kernel = functools.partial(_attention_kernel, num_heads=num_heads,
                                    head_dim=head_dim, wb=WB)
    x_atten_out = pl.pallas_call(
        attn_kernel,
        grid=(B_ // WB,),
        in_specs=[
            pl.BlockSpec((WB, N, attn_dim), lambda i: (i, 0, 0)),
            pl.BlockSpec((attn_dim, 3 * attn_dim), lambda i: (0, 0)),
            pl.BlockSpec((1, 3 * attn_dim), lambda i: (0, 0)),
            pl.BlockSpec((num_heads, N, N), lambda i: (0, 0, 0)),
            pl.BlockSpec((1, 1, attn_dim), lambda i: (i // bpb, 0, 0)),
        ],
        out_specs=pl.BlockSpec((WB, N, attn_dim), lambda i: (i, 0, 0)),
        out_shape=jax.ShapeDtypeStruct((B_, N, attn_dim), st),
        compiler_params=row_par,
    )(x_atten.reshape(B_, N, attn_dim), w_qkv_s, b_qkv_s, params["rel_bias"], gate3)

    # ---- spatial_interaction + gate + conv_norm, computed in window-token order
    # (all ops are 1x1 / per-batch-global, so only the cnn branch is transposed once)
    x_cnn_proj_win = _volume_to_windows(
        x_cnn_proj.reshape(B, D, H, W, attn_dim), window_size).reshape(B, S, attn_dim)
    xa_bs = x_atten_out.reshape(B, S, attn_dim)

    TS = _pick_chunk(S, 1024)
    n_chunks = S // TS
    dim16 = dim // 16

    h1, h1_sum, h1_ssq = pl.pallas_call(
        _spatial_pass1_kernel,
        grid=(B, n_chunks),
        in_specs=[
            pl.BlockSpec((1, TS, attn_dim), lambda b, j: (b, j, 0)),
            pl.BlockSpec((attn_dim, dim16), lambda b, j: (0, 0)),
            pl.BlockSpec((1, dim16), lambda b, j: (0, 0)),
        ],
        out_specs=[
            pl.BlockSpec((1, TS, dim16), lambda b, j: (b, j, 0)),
            pl.BlockSpec((1, 1, dim16), lambda b, j: (b, 0, 0)),
            pl.BlockSpec((1, 1, dim16), lambda b, j: (b, 0, 0)),
        ],
        out_shape=[
            jax.ShapeDtypeStruct((B, S, dim16), st),
            jax.ShapeDtypeStruct((B, 1, dim16), f32),
            jax.ShapeDtypeStruct((B, 1, dim16), f32),
        ],
        compiler_params=slab_par,
    )(xa_bs, w_si1, params["b_si1"])

    m1 = h1_sum / float(S)
    v1 = jnp.maximum(h1_ssq / float(S) - m1 * m1, 0.0)

    y_gated, y_sum, y_ssq = pl.pallas_call(
        _spatial_pass2_kernel,
        grid=(B, n_chunks),
        in_specs=[
            pl.BlockSpec((1, TS, dim16), lambda b, j: (b, j, 0)),
            pl.BlockSpec((1, 1, dim16), lambda b, j: (b, 0, 0)),
            pl.BlockSpec((1, 1, dim16), lambda b, j: (b, 0, 0)),
            pl.BlockSpec((1, TS, attn_dim), lambda b, j: (b, j, 0)),
            pl.BlockSpec((1, dim16), lambda b, j: (0, 0)),
            pl.BlockSpec((1, 1), lambda b, j: (0, 0)),
        ],
        out_specs=[
            pl.BlockSpec((1, TS, attn_dim), lambda b, j: (b, j, 0)),
            pl.BlockSpec((1, 1, attn_dim), lambda b, j: (b, 0, 0)),
            pl.BlockSpec((1, 1, attn_dim), lambda b, j: (b, 0, 0)),
        ],
        out_shape=[
            jax.ShapeDtypeStruct((B, S, attn_dim), st),
            jax.ShapeDtypeStruct((B, 1, attn_dim), f32),
            jax.ShapeDtypeStruct((B, 1, attn_dim), f32),
        ],
        compiler_params=slab_par,
    )(h1, m1, v1, x_cnn_proj_win, params["w_si2"], params["b_si2"])

    my = y_sum / float(S)
    vy = jnp.maximum(y_ssq / float(S) - my * my, 0.0)

    # ---- attn_norm + conv_norm + split-weight final projection (no concat) ----
    out = pl.pallas_call(
        _final_kernel,
        grid=(B, n_chunks),
        in_specs=[
            pl.BlockSpec((1, TS, attn_dim), lambda b, j: (b, j, 0)),
            pl.BlockSpec((1, attn_dim), lambda b, j: (0, 0)),
            pl.BlockSpec((1, attn_dim), lambda b, j: (0, 0)),
            pl.BlockSpec((1, TS, attn_dim), lambda b, j: (b, j, 0)),
            pl.BlockSpec((1, 1, attn_dim), lambda b, j: (b, 0, 0)),
            pl.BlockSpec((1, 1, attn_dim), lambda b, j: (b, 0, 0)),
            pl.BlockSpec((attn_dim, dim), lambda b, j: (0, 0)),
            pl.BlockSpec((attn_dim, dim), lambda b, j: (0, 0)),
            pl.BlockSpec((1, dim), lambda b, j: (0, 0)),
        ],
        out_specs=pl.BlockSpec((1, TS, dim), lambda b, j: (b, j, 0)),
        out_shape=jax.ShapeDtypeStruct((B, S, dim), f32),
        compiler_params=pltpu.CompilerParams(
            dimension_semantics=("parallel", "parallel"),
            vmem_limit_bytes=_VMEM_LIMIT),
    )(xa_bs, params["g_an"], params["be_an"], y_gated, my, vy,
      w_out_a, w_out_c, params["b_proj"])

    return out.reshape(B_, N, dim)


# ------------------------------------------------------------------- main ----
if __name__ == "__main__":
    dim = 32
    num_heads = 2
    window_size = (2, 2, 2)
    ksize = 3
    B = 1
    D = H = W = 4
    N = window_size[0] * window_size[1] * window_size[2]
    nW = (D // window_size[0]) * (H // window_size[1]) * (W // window_size[2])
    B_ = B * nW

    key = jax.random.PRNGKey(0)
    kx, kp = jax.random.split(key)
    x = jax.random.normal(kx, (B_, N, dim), jnp.float32)
    params = make_params(kp, dim, window_size, num_heads, ksize)

    out = mixing_attention_forward(params, x, D, H, W,
                                   window_size=window_size,
                                   num_heads=num_heads,
                                   ksize=ksize)
    out = jax.block_until_ready(out)
    assert out.shape == (B_, N, dim), out.shape
    assert bool(jnp.all(jnp.isfinite(out)))
    print("KERNEL_OK")
</pallas_src>

<mosaic_0001>
module attributes {stable_mosaic.version = 11 : i64} {
  func.func @_proj_fused_kernel(%arg0: i32, %arg1: memref<64x32xf32, #tpu.memory_space<vmem>>, %arg2: memref<32x16xbf16, #tpu.memory_space<vmem>>, %arg3: memref<1x16xf32, #tpu.memory_space<vmem>>, %arg4: memref<1x16xf32, #tpu.memory_space<vmem>>, %arg5: memref<1x16xf32, #tpu.memory_space<vmem>>, %arg6: memref<32x32xbf16, #tpu.memory_space<vmem>>, %arg7: memref<1x32xf32, #tpu.memory_space<vmem>>, %arg8: memref<1x32xf32, #tpu.memory_space<vmem>>, %arg9: memref<1x32xf32, #tpu.memory_space<vmem>>, %arg10: memref<64x16xbf16, #tpu.memory_space<vmem>>, %arg11: memref<64x32xbf16, #tpu.memory_space<vmem>>) attributes {dimension_semantics = [#tpu.dimension_semantics<parallel>], iteration_bounds = array<i64: 1>, scalar_prefetch = 0 : i64, scratch_operands = 0 : i64, tpu.core_type = #tpu.core_type<tc>, window_params = [{transform_indices = @transform_0, window_bounds = array<i64: 64, 32>}, {pipeline_mode = #tpu.pipeline_mode<synchronous>, transform_indices = @transform_1, window_bounds = array<i64: 32, 16>}, {pipeline_mode = #tpu.pipeline_mode<synchronous>, transform_indices = @transform_2, window_bounds = array<i64: 1, 16>}, {pipeline_mode = #tpu.pipeline_mode<synchronous>, transform_indices = @transform_3, window_bounds = array<i64: 1, 16>}, {pipeline_mode = #tpu.pipeline_mode<synchronous>, transform_indices = @transform_4, window_bounds = array<i64: 1, 16>}, {pipeline_mode = #tpu.pipeline_mode<synchronous>, transform_indices = @transform_5, window_bounds = array<i64: 32, 32>}, {pipeline_mode = #tpu.pipeline_mode<synchronous>, transform_indices = @transform_6, window_bounds = array<i64: 1, 32>}, {pipeline_mode = #tpu.pipeline_mode<synchronous>, transform_indices = @transform_7, window_bounds = array<i64: 1, 32>}, {pipeline_mode = #tpu.pipeline_mode<synchronous>, transform_indices = @transform_8, window_bounds = array<i64: 1, 32>}, {transform_indices = @transform_9, window_bounds = array<i64: 64, 16>}, {transform_indices = @transform_10, window_bounds = array<i64: 64, 32>}]} {
    %c0 = arith.constant 0 : index
    %c0_0 = arith.constant 0 : index
    %0 = vector.load %arg1[%c0, %c0_0] : memref<64x32xf32, #tpu.memory_space<vmem>>, vector<64x32xf32>
    %c0_1 = arith.constant 0 : index
    %c0_2 = arith.constant 0 : index
    %1 = vector.load %arg2[%c0_1, %c0_2] : memref<32x16xbf16, #tpu.memory_space<vmem>>, vector<32x16xbf16>
    %2 = arith.truncf %0 : vector<64x32xf32> to vector<64x32xbf16>
    %cst = arith.constant dense<0.000000e+00> : vector<64x16xf32>
    %3 = tpu.matmul %2, %1, %cst {dimension_numbers = #tpu.dot_dimension_numbers<[1], [0], [0], [1], [0, 0, 1, 1], [], []>} : vector<64x32xbf16>, vector<32x16xbf16>, vector<64x16xf32> -> vector<64x16xf32>
    %c0_3 = arith.constant 0 : index
    %c0_4 = arith.constant 0 : index
    %4 = vector.load %arg3[%c0_3, %c0_4] : memref<1x16xf32, #tpu.memory_space<vmem>>, vector<1x16xf32>
    %5 = vector.broadcast %4 : vector<1x16xf32> to vector<64x16xf32>
    %6 = arith.addf %3, %5 : vector<64x16xf32>
    %c0_5 = arith.constant 0 : index
    %c0_6 = arith.constant 0 : index
    %7 = vector.load %arg4[%c0_5, %c0_6] : memref<1x16xf32, #tpu.memory_space<vmem>>, vector<1x16xf32>
    %c0_7 = arith.constant 0 : index
    %c0_8 = arith.constant 0 : index
    %8 = vector.load %arg5[%c0_7, %c0_8] : memref<1x16xf32, #tpu.memory_space<vmem>>, vector<1x16xf32>
    %cst_9 = arith.constant dense<0.000000e+00> : vector<64xf32>
    %9 = vector.multi_reduction <add>, %6, %cst_9 [1] : vector<64x16xf32> to vector<64xf32>
    %10 = vector.shape_cast %9 : vector<64xf32> to vector<64x1xf32>
    %cst_10 = arith.constant 1.600000e+01 : f32
    %11 = vector.broadcast %cst_10 : f32 to vector<64x1xf32>
    %12 = arith.divf %10, %11 : vector<64x1xf32>
    %13 = vector.broadcast %12 : vector<64x1xf32> to vector<64x16xf32>
    %14 = arith.subf %6, %13 : vector<64x16xf32>
    %15 = arith.mulf %14, %14 : vector<64x16xf32>
    %cst_11 = arith.constant dense<0.000000e+00> : vector<64xf32>
    %16 = vector.multi_reduction <add>, %15, %cst_11 [1] : vector<64x16xf32> to vector<64xf32>
    %17 = vector.shape_cast %16 : vector<64xf32> to vector<64x1xf32>
    %cst_12 = arith.constant 1.600000e+01 : f32
    %18 = vector.broadcast %cst_12 : f32 to vector<64x1xf32>
    %19 = arith.divf %17, %18 : vector<64x1xf32>
    %20 = vector.broadcast %12 : vector<64x1xf32> to vector<64x16xf32>
    %21 = arith.subf %6, %20 : vector<64x16xf32>
    %cst_13 = arith.constant 9.99999974E-6 : f32
    %22 = vector.broadcast %cst_13 : f32 to vector<64x1xf32>
    %23 = arith.addf %19, %22 : vector<64x1xf32>
    %24 = math.rsqrt %23 : vector<64x1xf32>
    %25 = vector.broadcast %24 : vector<64x1xf32> to vector<64x16xf32>
    %26 = arith.mulf %21, %25 : vector<64x16xf32>
    %27 = vector.broadcast %7 : vector<1x16xf32> to vector<64x16xf32>
    %28 = arith.mulf %26, %27 : vector<64x16xf32>
    %29 = vector.broadcast %8 : vector<1x16xf32> to vector<64x16xf32>
    %30 = arith.addf %28, %29 : vector<64x16xf32>
    %31 = arith.truncf %30 : vector<64x16xf32> to vector<64x16xbf16>
    %c0_14 = arith.constant 0 : index
    %c0_15 = arith.constant 0 : index
    %32 = vector.load %arg10[%c0_14, %c0_15] : memref<64x16xbf16, #tpu.memory_space<vmem>>, vector<64x16xbf16>
    tpu.vector_store %arg10[%c0_14, %c0_15], %31 {strides = array<i32>} : memref<64x16xbf16, #tpu.memory_space<vmem>>, vector<64x16xbf16>,
    %c0_16 = arith.constant 0 : index
    %c0_17 = arith.constant 0 : index
    %33 = vector.load %arg6[%c0_16, %c0_17] : memref<32x32xbf16, #tpu.memory_space<vmem>>, vector<32x32xbf16>
    %34 = arith.truncf %0 : vector<64x32xf32> to vector<64x32xbf16>
    %cst_18 = arith.constant dense<0.000000e+00> : vector<64x32xf32>
    %35 = tpu.matmul %34, %33, %cst_18 {dimension_numbers = #tpu.dot_dimension_numbers<[1], [0], [0], [1], [0, 0, 1, 1], [], []>} : vector<64x32xbf16>, vector<32x32xbf16>, vector<64x32xf32> -> vector<64x32xf32>
    %c0_19 = arith.constant 0 : index
    %c0_20 = arith.constant 0 : index
    %36 = vector.load %arg7[%c0_19, %c0_20] : memref<1x32xf32, #tpu.memory_space<vmem>>, vector<1x32xf32>
    %37 = vector.broadcast %36 : vector<1x32xf32> to vector<64x32xf32>
    %38 = arith.addf %35, %37 : vector<64x32xf32>
    %c0_21 = arith.constant 0 : index
    %c0_22 = arith.constant 0 : index
    %39 = vector.load %arg8[%c0_21, %c0_22] : memref<1x32xf32, #tpu.memory_space<vmem>>, vector<1x32xf32>
    %c0_23 = arith.constant 0 : index
    %c0_24 = arith.constant 0 : index
    %40 = vector.load %arg9[%c0_23, %c0_24] : memref<1x32xf32, #tpu.memory_space<vmem>>, vector<1x32xf32>
    %cst_25 = arith.constant dense<0.000000e+00> : vector<64xf32>
    %41 = vector.multi_reduction <add>, %38, %cst_25 [1] : vector<64x32xf32> to vector<64xf32>
    %42 = vector.shape_cast %41 : vector<64xf32> to vector<64x1xf32>
    %cst_26 = arith.constant 3.200000e+01 : f32
    %43 = vector.broadcast %cst_26 : f32 to vector<64x1xf32>
    %44 = arith.divf %42, %43 : vector<64x1xf32>
    %45 = vector.broadcast %44 : vector<64x1xf32> to vector<64x32xf32>
    %46 = arith.subf %38, %45 : vector<64x32xf32>
    %47 = arith.mulf %46, %46 : vector<64x32xf32>
    %cst_27 = arith.constant dense<0.000000e+00> : vector<64xf32>
    %48 = vector.multi_reduction <add>, %47, %cst_27 [1] : vector<64x32xf32> to vector<64xf32>
    %49 = vector.shape_cast %48 : vector<64xf32> to vector<64x1xf32>
    %cst_28 = arith.constant 3.200000e+01 : f32
    %50 = vector.broadcast %cst_28 : f32 to vector<64x1xf32>
    %51 = arith.divf %49, %50 : vector<64x1xf32>
    %52 = vector.broadcast %44 : vector<64x1xf32> to vector<64x32xf32>
    %53 = arith.subf %38, %52 : vector<64x32xf32>
    %cst_29 = arith.constant 9.99999974E-6 : f32
    %54 = vector.broadcast %cst_29 : f32 to vector<64x1xf32>
    %55 = arith.addf %51, %54 : vector<64x1xf32>
    %56 = math.rsqrt %55 : vector<64x1xf32>
    %57 = vector.broadcast %56 : vector<64x1xf32> to vector<64x32xf32>
    %58 = arith.mulf %53, %57 : vector<64x32xf32>
    %59 = vector.broadcast %39 : vector<1x32xf32> to vector<64x32xf32>
    %60 = arith.mulf %58, %59 : vector<64x32xf32>
    %61 = vector.broadcast %40 : vector<1x32xf32> to vector<64x32xf32>
    %62 = arith.addf %60, %61 : vector<64x32xf32>
    %63 = arith.truncf %62 : vector<64x32xf32> to vector<64x32xbf16>
    %c0_30 = arith.constant 0 : index
    %c0_31 = arith.constant 0 : index
    %64 = vector.load %arg11[%c0_30, %c0_31] : memref<64x32xbf16, #tpu.memory_space<vmem>>, vector<64x32xbf16>
    tpu.vector_store %arg11[%c0_30, %c0_31], %63 {strides = array<i32>} : memref<64x32xbf16, #tpu.memory_space<vmem>>, vector<64x32xbf16>,
    return
  }
  func.func @transform_0(%arg0: i32) -> (i32, i32) {
    %c0_i32 = arith.constant 0 : i32
    %c0_i32_0 = arith.constant 0 : i32
    return %arg0, %c0_i32 : i32, i32
  }
  func.func @transform_1(%arg0: i32) -> (i32, i32) {
    %c0_i32 = arith.constant 0 : i32
    %c0_i32_0 = arith.constant 0 : i32
    %c0_i32_1 = arith.constant 0 : i32
    return %c0_i32, %c0_i32_0 : i32, i32
  }
  func.func @transform_2(%arg0: i32) -> (i32, i32) {
    %c0_i32 = arith.constant 0 : i32
    %c0_i32_0 = arith.constant 0 : i32
    %c0_i32_1 = arith.constant 0 : i32
    return %c0_i32, %c0_i32_0 : i32, i32
  }
  func.func @transform_3(%arg0: i32) -> (i32, i32) {
    %c0_i32 = arith.constant 0 : i32
    %c0_i32_0 = arith.constant 0 : i32
    %c0_i32_1 = arith.constant 0 : i32
    return %c0_i32, %c0_i32_0 : i32, i32
  }
  func.func @transform_4(%arg0: i32) -> (i32, i32) {
    %c0_i32 = arith.constant 0 : i32
    %c0_i32_0 = arith.constant 0 : i32
    %c0_i32_1 = arith.constant 0 : i32
    return %c0_i32, %c0_i32_0 : i32, i32
  }
  func.func @transform_5(%arg0: i32) -> (i32, i32) {
    %c0_i32 = arith.constant 0 : i32
    %c0_i32_0 = arith.constant 0 : i32
    %c0_i32_1 = arith.constant 0 : i32
    return %c0_i32, %c0_i32_0 : i32, i32
  }
  func.func @transform_6(%arg0: i32) -> (i32, i32) {
    %c0_i32 = arith.constant 0 : i32
    %c0_i32_0 = arith.constant 0 : i32
    %c0_i32_1 = arith.constant 0 : i32
    return %c0_i32, %c0_i32_0 : i32, i32
  }
  func.func @transform_7(%arg0: i32) -> (i32, i32) {
    %c0_i32 = arith.constant 0 : i32
    %c0_i32_0 = arith.constant 0 : i32
    %c0_i32_1 = arith.constant 0 : i32
    return %c0_i32, %c0_i32_0 : i32, i32
  }
  func.func @transform_8(%arg0: i32) -> (i32, i32) {
    %c0_i32 = arith.constant 0 : i32
    %c0_i32_0 = arith.constant 0 : i32
    %c0_i32_1 = arith.constant 0 : i32
    return %c0_i32, %c0_i32_0 : i32, i32
  }
  func.func @transform_9(%arg0: i32) -> (i32, i32) {
    %c0_i32 = arith.constant 0 : i32
    %c0_i32_0 = arith.constant 0 : i32
    return %arg0, %c0_i32 : i32, i32
  }
  func.func @transform_10(%arg0: i32) -> (i32, i32) {
    %c0_i32 = arith.constant 0 : i32
    %c0_i32_0 = arith.constant 0 : i32
    return %arg0, %c0_i32 : i32, i32
  }
}

</mosaic_0001>

<bundles_post_ra>
// kernel: tpu_custom_call.1
= control target key start
LH: loop header
LB: loop body
LE: loop exit
PB: predicated region body
PF: predicated region fallthrough
CT: control target
= control target key end

     0   :  { %vm67_vm0 = vcmask 261120   ;;  %vm111_vm1 = vcmask 130048   ;;  %vm325_vm10 = vcmask 125952   ;;  %vm598_vm11 = vcmask 257024   ;;  %s1269_s1 = inlined_call_operand.vmem [shape: bf16[32,16], index: 1, kind: input, shape index: {}]   ;;  %s1270_s5 = inlined_call_operand.vmem [shape: bf16[32,32], index: 5, kind: input, shape index: {}]   ;;  %s1271_s0 = inlined_call_operand.vmem [shape: f32[64,32], index: 0, kind: input, shape index: {}]   ;;  %s1272_s2 = inlined_call_operand.vmem [shape: f32[1,16], index: 2, kind: input, shape index: {}]   ;;  %s1273_s6 = inlined_call_operand.vmem [shape: f32[1,32], index: 6, kind: input, shape index: {}]   ;;  %s1274_s3 = inlined_call_operand.vmem [shape: f32[1,16], index: 3, kind: input, shape index: {}]   ;;  %s1275_s4 = inlined_call_operand.vmem [shape: f32[1,16], index: 4, kind: input, shape index: {}]   ;;  %s1276_s7 = inlined_call_operand.vmem [shape: f32[1,32], index: 7, kind: input, shape index: {}]   ;;  %s1277_s8 = inlined_call_operand.vmem [shape: f32[1,32], index: 8, kind: input, shape index: {}]   ;;  %s1278_s9 = inlined_call_operand.vmem [shape: bf16[64,16], index: 9, kind: output, shape index: {0}]   ;;  %s1279_s10 = inlined_call_operand.vmem [shape: bf16[64,32], index: 10, kind: output, shape index: {1}]  }
   0x1   :  { %v640_v0 = vld [vmem:[%s1269_s1 + $0x8] sm:$0xff]  ;;  %v639_v2 = vld [vmem:[%s1269_s1] sm:$0xff]  ;;  %v37_v10 = vld [vmem:[%s1271_s0 + $0x10] sm:$0xff] }
   0x2   :  { %v642_v1 = vld [vmem:[%s1270_s5 + $0x8] sm:$0xff]  ;;  %86 = vmatpush.bf16.msra.mxu0 %v640_v0  ;;  %v641_v3 = vld [vmem:[%s1270_s5] sm:$0xff]  ;;  %643 = vmatpush.bf16.msra.mxu2 %v640_v0  ;;  %v38_v11 = vld [vmem:[%s1271_s0 + $0x18] sm:$0xff] }
   0x3   :  { %360 = vmatpush.bf16.msra.mxu1 %v642_v1  ;;  %v35_v4 = vld [vmem:[%s1271_s0] sm:$0xff]  ;;  %v36_v5 = vld [vmem:[%s1271_s0 + $0x8] sm:$0xff]  ;;  %645 = vmatpush.bf16.msra.mxu3 %v642_v1  ;;  %v41_v12 = vld [vmem:[%s1271_s0 + $0x30] sm:$0xff]  ;;  %v48_v14 = vpack.c.bf16 %v38_v11, %v37_v10 }
   0x4   :  { %v39_v6 = vld [vmem:[%s1271_s0 + $0x20] sm:$0xff]  ;;  %v40_v7 = vld [vmem:[%s1271_s0 + $0x28] sm:$0xff]  ;;  %v47_v8 = vpack.c.bf16 %v36_v5, %v35_v4  ;;  %v42_v13 = vld [vmem:[%s1271_s0 + $0x38] sm:$0xff] }
   0x5   :  { %v49_v9 = vpack.c.bf16 %v40_v7, %v39_v6  ;;  %v50_v15 = vpack.c.bf16 %v42_v13, %v41_v12  ;;  %v795_v16 = vld [vmem:[%s1272_s2] ss:$0 sm:$0xff] }
   0x6   :  { %87 = vmatpush.bf16.msra.mxu0 %v639_v2  ;;  %644 = vmatpush.bf16.msra.mxu2 %v639_v2  ;;  %v650_v17 = vld [vmem:[%s1273_s6] ss:$0 sm:$0xff]  ;;  %v691_v2 = vmov 32.0  }
   0x7   :  { %361 = vmatpush.bf16.msra.mxu1 %v641_v3  ;;  %646 = vmatpush.bf16.msra.mxu3 %v641_v3  ;;  %655 = vrcp.f32 %v691_v2  ;;  %v692_v3 = vmov 16.0  }
   0x8   :  { %657 = vrcp.f32 %v692_v3 }
   0x9   :  { %623 = vmatmul.msk.bf16.vlgmr.msra.gmra.mxu0 %vm67_vm0, %v47_v8  ;;  %625 = vmatmul.msk.bf16.vlgmr.msra.gmra.mxu2 %vm67_vm0, %v49_v9 }
   0xa   :  { %635 = vmatmul.msk.bf16.vlgmr.msra.gmra.mxu1 %vm67_vm0, %v47_v8  ;;  %637 = vmatmul.msk.bf16.vlgmr.msra.gmra.mxu3 %vm67_vm0, %v49_v9 }
   0xd   :  { %v656_v4 = vpop.eup %655 }
   0xe   :  { %v658_v5 = vpop.eup %657  ;;  %v410_v6 = vmul.f32 32.0, %v656_v4  ;;  %vm414_vm2 = vweird.f32 %v656_v4 }
   0xf   :  { %v137_v7 = vmul.f32 16.0, %v658_v5  ;;  %vm141_vm3 = vweird.f32 %v658_v5 }
  0x10   :  { %v411_v8 = vsub.f32 1.0, %v410_v6 }
  0x11   :  { %v138_v9 = vsub.f32 1.0, %v137_v7 }
  0x12   :  { %v412_v10 = vmul.f32 %v656_v4, %v411_v8 }
  0x13   :  { %v139_v11 = vmul.f32 %v658_v5, %v138_v9 }
  0x14   :  { %v413_v12 = vadd.f32 %v656_v4, %v412_v10 }
  0x15   :  { %v140_v13 = vadd.f32 %v658_v5, %v139_v11 }
  0x19   :  { %624 = vmatmul.msk.bf16.gmra.mxu0 %vm67_vm0, %v48_v14  ;;  %626 = vmatmul.msk.bf16.gmra.mxu2 %vm67_vm0, %v50_v15 }
  0x1a   :  { %636 = vmatmul.msk.bf16.gmra.mxu1 %vm67_vm0, %v48_v14  ;;  %638 = vmatmul.msk.bf16.gmra.mxu3 %vm67_vm0, %v50_v15  ;;  %v872_v14 = vsel %vm414_vm2, %v656_v4, %v413_v12  ;;  %v874_v15 = vsel %vm141_vm3, %v658_v5, %v140_v13 }
  0x86   :  { %v89_v18 = vpop.f32.mrf.mxu0 }
  0x87   :  { %v363_v19 = vpop.f32.mrf.mxu1  ;;  %v801_v20 = vadd.f32 %v795_v16, %v89_v18 }
  0x88   :  { %v803_v21 = vadd.f32 %v650_v17, %v363_v19 }
  0x89   :  { %v112_v23 = vsel %vm111_vm1, %v801_v20, 0.0 }
  0x8a   :  { %v385_v22 = vsel %vm67_vm0, %v803_v21, 0.0  ;;  %113 = vadd.xlane.f32.xlu0 %v112_v23 }
  0x8b   :  { %386 = vadd.xlane.f32.xlu2 %v385_v22 }
  0x8c   :  { %v99_v25 = vpop.f32.mrf.mxu2 }
  0x8d   :  { %v373_v24 = vpop.f32.mrf.mxu3  ;;  %v812_v27 = vadd.f32 %v795_v16, %v99_v25 }
  0x8e   :  { %v809_v26 = vadd.f32 %v650_v17, %v373_v24  ;;  %v91_v29 = vpop.f32.mrf.mxu0 }
  0x8f   :  { %v365_v28 = vpop.f32.mrf.mxu1  ;;  %v124_v30 = vsel %vm111_vm1, %v812_v27, 0.0  ;;  %v819_v32 = vadd.f32 %v795_v16, %v91_v29 }
  0x90   :  { %v397_v31 = vsel %vm67_vm0, %v809_v26, 0.0  ;;  %v835_v43 = vadd.f32 %v650_v17, %v365_v28 }
  0x91   :  { %v115_v41 = vsel %vm111_vm1, %v819_v32, 0.0 }
  0x92   :  { %398 = vadd.xlane.f32.xlu0 %v397_v31  ;;  %v388_v49 = vsel %vm67_vm0, %v835_v43, 0.0 }
  0x93   :  { %125 = vadd.xlane.f32.xlu2 %v124_v30 }
  0x94   :  { %v101_v34 = vpop.f32.mrf.mxu2 }
  0x95   :  { %v375_v33 = vpop.f32.mrf.mxu3  ;;  %v824_v36 = vadd.f32 %v795_v16, %v101_v34 }
  0x96   :  { %v821_v35 = vadd.f32 %v650_v17, %v375_v33  ;;  %v94_v40 = vpop.f32.mrf.mxu0 }
  0x97   :  { %v368_v37 = vpop.f32.mrf.mxu1  ;;  %v127_v39 = vsel %vm111_vm1, %v824_v36, 0.0  ;;  %v833_v42 = vadd.f32 %v795_v16, %v94_v40 }
  0x98   :  { %v400_v38 = vsel %vm67_vm0, %v821_v35, 0.0  ;;  %v845_v50 = vadd.f32 %v650_v17, %v368_v37 }
  0x99   :  { %401 = vadd.xlane.f32.xlu1 %v400_v38  ;;  %v118_v45 = vsel %vm111_vm1, %v833_v42, 0.0 }
  0x9a   :  { %116 = vadd.xlane.f32.xlu0 %v115_v41  ;;  %v391_v54 = vsel %vm67_vm0, %v845_v50, 0.0 }
  0x9b   :  { %128 = vadd.xlane.f32.xlu2 %v127_v39 }
  0x9c   :  { %v104_v51 = vpop.f32.mrf.mxu2 }
  0x9d   :  { %v378_v46 = vpop.f32.mrf.mxu3  ;;  %v848_v52 = vadd.f32 %v795_v16, %v104_v51 }
  0x9e   :  { %v850_v53 = vadd.f32 %v650_v17, %v378_v46  ;;  %v96_v58 = vpop.f32.mrf.mxu0 }
  0x9f   :  { %v370_v44 = vpop.f32.mrf.mxu1  ;;  %v130_v56 = vsel %vm111_vm1, %v848_v52, 0.0  ;;  %v861_v60 = vadd.f32 %v795_v16, %v96_v58 }
  0xa0   :  { %v839_v47 = vadd.f32 %v650_v17, %v370_v44  ;;  %v403_v55 = vsel %vm67_vm0, %v850_v53, 0.0 }
  0xa1   :  { %119 = vadd.xlane.f32.xlu1 %v118_v45  ;;  %v121_v62 = vsel %vm111_vm1, %v861_v60, 0.0 }
  0xa2   :  { %v394_v48 = vsel %vm67_vm0, %v839_v47, 0.0  ;;  %389 = vadd.xlane.f32.xlu0 %v388_v49 }
  0xa3   :  { %395 = vadd.xlane.f32.xlu2 %v394_v48 }
  0xa4   :  { %v106_v63 = vpop.f32.mrf.mxu2 }
  0xa5   :  { %v380_v57 = vpop.f32.mrf.mxu3  ;;  %v868_v0 = vadd.f32 %v795_v16, %v106_v63 }
  0xa6   :  { %v858_v59 = vadd.f32 %v650_v17, %v380_v57 }
  0xa7   :  { %v133_v1 = vsel %vm111_vm1, %v868_v0, 0.0 }
  0xa8   :  { %v406_v61 = vsel %vm67_vm0, %v858_v59, 0.0 }
  0xa9   :  { %392 = vadd.xlane.f32.xlu1 %v391_v54 }
  0xaa   :  { %131 = vadd.xlane.f32.xlu0 %v130_v56 }
  0xab   :  { %404 = vadd.xlane.f32.xlu2 %v403_v55 }
  0xb1   :  { %122 = vadd.xlane.f32.xlu1 %v121_v62 }
  0xb2   :  { %407 = vadd.xlane.f32.xlu0 %v406_v61 }
  0xb9   :  { %134 = vadd.xlane.f32.xlu1 %v133_v1 }
  0xfd   :  { %v114_v17 = vpop.xlane.xlu0 %113 }
  0xfe   :  { %v387_v16 = vpop.xlane.xlu2 %386  ;;  %v143_v19 = vmul.f32 %v874_v15, %v114_v17 }
  0xff   :  { %v416_v18 = vmul.f32 %v872_v14, %v387_v16 }
 0x100   :  { %v882_v23 = vsub.f32 %v801_v20, %v143_v19 }
 0x101   :  { %v879_v22 = vsub.f32 %v803_v21, %v416_v18 }
 0x102   :  { %v159_v25 = vmul.f32 %v882_v23, %v882_v23 }
 0x103   :  { %v432_v24 = vmul.f32 %v879_v22, %v879_v22 }
 0x104   :  { %v167_v29 = vsel %vm111_vm1, %v159_v25, 0.0 }
 0x105   :  { %v440_v28 = vsel %vm67_vm0, %v432_v24, 0.0  ;;  %168 = vadd.xlane.f32.xlu1 %v167_v29  ;;  %v399_v31 = vpop.xlane.xlu0 %398 }
 0x106   :  { %v126_v30 = vpop.xlane.xlu2 %125  ;;  %441 = vadd.xlane.f32.xlu0 %v440_v28  ;;  %v420_v33 = vmul.f32 %v872_v14, %v399_v31 }
 0x107   :  { %v147_v21 = vmul.f32 %v874_v15, %v126_v30 }
 0x108   :  { %v896_v34 = vsub.f32 %v809_v26, %v420_v33 }
 0x109   :  { %v893_v20 = vsub.f32 %v812_v27, %v147_v21 }
 0x10a   :  { %v436_v38 = vmul.f32 %v896_v34, %v896_v34 }
 0x10b   :  { %v163_v37 = vmul.f32 %v893_v20, %v893_v20 }
 0x10c   :  { %v902_v39 = vpop.xlane.xlu1 %401  ;;  %v452_v41 = vsel %vm67_vm0, %v436_v38, 0.0 }
 0x10d   :  { %v179_v40 = vsel %vm111_vm1, %v163_v37, 0.0  ;;  %453 = vadd.xlane.f32.xlu1 %v452_v41  ;;  %v117_v27 = vpop.xlane.xlu0 %116 }
 0x10e   :  { %180 = vadd.xlane.f32.xlu2 %v179_v40  ;;  %v129_v44 = vpop.xlane.xlu2 %128  ;;  %v144_v26 = vmul.f32 %v874_v15, %v117_v27 }
 0x10f   :  { %v148_v45 = vmul.f32 %v874_v15, %v129_v44 }
 0x110   :  { %v912_v48 = vsub.f32 %v819_v32, %v144_v26 }
 0x111   :  { %v909_v46 = vsub.f32 %v824_v36, %v148_v45 }
 0x112   :  { %v160_v51 = vmul.f32 %v912_v48, %v912_v48 }
 0x113   :  { %v164_v49 = vmul.f32 %v909_v46, %v909_v46 }
 0x114   :  { %v120_v54 = vpop.xlane.xlu1 %119  ;;  %v170_v56 = vsel %vm111_vm1, %v160_v51, 0.0 }
 0x115   :  { %v182_v55 = vsel %vm111_vm1, %v164_v49, 0.0  ;;  %v145_v57 = vmul.f32 %v874_v15, %v120_v54  ;;  %v390_v36 = vpop.xlane.xlu0 %389 }
 0x116   :  { %v396_v58 = vpop.xlane.xlu2 %395  ;;  %183 = vadd.xlane.f32.xlu0 %v182_v55  ;;  %171 = vadd.xlane.f32.xlu2 %v170_v56  ;;  %v417_v32 = vmul.f32 %v872_v14, %v390_v36 }
 0x117   :  { %v923_v61 = vsub.f32 %v833_v42, %v145_v57  ;;  %v419_v62 = vmul.f32 %v872_v14, %v396_v58 }
 0x118   :  { %v927_v63 = vsub.f32 %v835_v43, %v417_v32 }
 0x119   :  { %v161_v1 = vmul.f32 %v923_v61, %v923_v61  ;;  %v934_v3 = vsub.f32 %v839_v47, %v419_v62 }
 0x11a   :  { %v433_v2 = vmul.f32 %v927_v63, %v927_v63 }
 0x11b   :  { %v173_v5 = vsel %vm111_vm1, %v161_v1, 0.0  ;;  %v435_v11 = vmul.f32 %v934_v3, %v934_v3 }
 0x11c   :  { %v393_v4 = vpop.xlane.xlu1 %392  ;;  %v443_v42 = vsel %vm67_vm0, %v433_v2, 0.0 }
 0x11d   :  { %v418_v6 = vmul.f32 %v872_v14, %v393_v4  ;;  %444 = vadd.xlane.f32.xlu1 %v443_v42  ;;  %v132_v43 = vpop.xlane.xlu0 %131  ;;  %v449_v18 = vsel %vm67_vm0, %v435_v11, 0.0 }
 0x11e   :  { %v405_v7 = vpop.xlane.xlu2 %404  ;;  %174 = vadd.xlane.f32.xlu0 %v173_v5  ;;  %v149_v8 = vmul.f32 %v874_v15, %v132_v43 }
 0x11f   :  { %v941_v9 = vsub.f32 %v845_v50, %v418_v6  ;;  %v422_v10 = vmul.f32 %v872_v14, %v405_v7 }
 0x120   :  { %v945_v47 = vsub.f32 %v848_v52, %v149_v8 }
 0x121   :  { %v434_v12 = vmul.f32 %v941_v9, %v941_v9  ;;  %v955_v17 = vsub.f32 %v850_v53, %v422_v10 }
 0x122   :  { %v165_v13 = vmul.f32 %v945_v47, %v945_v47 }
 0x123   :  { %v446_v16 = vsel %vm67_vm0, %v434_v12, 0.0  ;;  %v438_v53 = vmul.f32 %v955_v17, %v955_v17 }
 0x124   :  { %v123_v50 = vpop.xlane.xlu1 %122  ;;  %447 = vadd.xlane.f32.xlu2 %v446_v16  ;;  %v185_v52 = vsel %vm111_vm1, %v165_v13, 0.0 }
 0x125   :  { %v146_v19 = vmul.f32 %v874_v15, %v123_v50  ;;  %186 = vadd.xlane.f32.xlu1 %v185_v52  ;;  %v408_v24 = vpop.xlane.xlu0 %407  ;;  %v458_v21 = vsel %vm67_vm0, %v438_v53, 0.0 }
 0x126   :  { %450 = vadd.xlane.f32.xlu0 %v449_v18  ;;  %v423_v28 = vmul.f32 %v872_v14, %v408_v24 }
 0x127   :  { %v961_v25 = vsub.f32 %v861_v60, %v146_v19  ;;  %v421_v60 = vmul.f32 %v872_v14, %v902_v39 }
 0x128   :  { %v969_v30 = vsub.f32 %v858_v59, %v423_v28  ;;  %v1016_v28 = vld [vmem:[%s1274_s3] ss:$0 sm:$0xff] }
 0x129   :  { %v162_v29 = vmul.f32 %v961_v25, %v961_v25  ;;  %v984_v41 = vsub.f32 %v821_v35, %v421_v60 }
 0x12a   :  { %v439_v40 = vmul.f32 %v969_v30, %v969_v30 }
 0x12b   :  { %v176_v33 = vsel %vm111_vm1, %v162_v29, 0.0  ;;  %v437_v39 = vmul.f32 %v984_v41, %v984_v41 }
 0x12c   :  { %v135_v31 = vpop.xlane.xlu1 %134  ;;  %v461_v27 = vsel %vm67_vm0, %v439_v40, 0.0 }
 0x12d   :  { %v150_v37 = vmul.f32 %v874_v15, %v135_v31  ;;  %177 = vadd.xlane.f32.xlu1 %v176_v33 }
 0x12e   :  { %459 = vadd.xlane.f32.xlu0 %v458_v21  ;;  %v1024_v21 = vld [vmem:[%s1276_s7] ss:$0 sm:$0xff] }
 0x12f   :  { %v977_v38 = vsub.f32 %v868_v0, %v150_v37  ;;  %v455_v0 = vsel %vm67_vm0, %v437_v39, 0.0  ;;  %v1032_v37 = vld [vmem:[%s1275_s4] ss:$0 sm:$0xff] }
 0x131   :  { %v166_v59 = vmul.f32 %v977_v38, %v977_v38 }
 0x133   :  { %v188_v44 = vsel %vm111_vm1, %v166_v59, 0.0 }
 0x134   :  { %189 = vadd.xlane.f32.xlu2 %v188_v44  ;;  %v1039_v44 = vld [vmem:[%s1277_s8] ss:$0 sm:$0xff] }
 0x135   :  { %462 = vadd.xlane.f32.xlu1 %v461_v27 }
 0x13c   :  { %456 = vadd.xlane.f32.xlu2 %v455_v0 }
 0x178   :  { %v169_v45 = vpop.xlane.xlu1 %168 }
 0x179   :  { %v442_v26 = vpop.xlane.xlu0 %441  ;;  %v191_v49 = vmul.f32 %v169_v45, %v874_v15 }
 0x17a   :  { %v464_v51 = vmul.f32 %v442_v26, %v872_v14 }
 0x17b   :  { %v199_v35 = vadd.f32 1e-05, %v191_v49 }
 0x17c   :  { %v472_v54 = vadd.f32 1e-05, %v464_v51 }
 0x17d   :  { %659 = vrsqrt.f32 %v199_v35  ;;  %vm213_vm6 = vweird.f32 %v199_v35 }
 0x17e   :  { %661 = vrsqrt.f32 %v472_v54  ;;  %vm486_vm8 = vweird.f32 %v472_v54 }
 0x180   :  { %v454_v56 = vpop.xlane.xlu1 %453 }
 0x181   :  { %v181_v55 = vpop.xlane.xlu2 %180  ;;  %v468_v58 = vmul.f32 %v454_v56, %v872_v14 }
 0x182   :  { %v195_v57 = vmul.f32 %v181_v55, %v874_v15 }
 0x183   :  { %v660_v36 = vpop.eup %659  ;;  %v997_v62 = vadd.f32 1e-05, %v468_v58 }
 0x184   :  { %v995_v32 = vadd.f32 1e-05, %v195_v57  ;;  %v662_v1 = vpop.eup %661  ;;  %v208_v2 = vmul.f32 %v660_v36, %v199_v35  ;;  %vm214_vm4 = vweird.f32 %v660_v36 }
 0x185   :  { %v481_v4 = vmul.f32 %v662_v1, %v472_v54  ;;  %vm487_vm5 = vweird.f32 %v662_v1  ;;  %vm215_vm7 = vmor %vm213_vm6, %vm214_vm4  ;;  %vm526_vm0 = vweird.f32 %v997_v62 }
 0x186   :  { %663 = vrsqrt.f32 %v995_v32  ;;  %v209_v5 = vmul.f32 %v660_v36, %v208_v2  ;;  %vm488_vm9 = vmor %vm486_vm8, %vm487_vm5  ;;  %vm253_vm12 = vweird.f32 %v995_v32 }
 0x187   :  { %665 = vrsqrt.f32 %v997_v62  ;;  %v482_v42 = vmul.f32 %v662_v1, %v481_v4 }
 0x188   :  { %v210_v6 = vmul.f32 0.5, %v209_v5 }
 0x189   :  { %v172_v7 = vpop.xlane.xlu2 %171  ;;  %v184_v43 = vpop.xlane.xlu0 %183  ;;  %v483_v8 = vmul.f32 0.5, %v482_v42 }
 0x18a   :  { %v192_v10 = vmul.f32 %v172_v7, %v874_v15  ;;  %v196_v11 = vmul.f32 %v184_v43, %v874_v15  ;;  %v211_v12 = vsub.f32 1.5, %v210_v6 }
 0x18b   :  { %v484_v16 = vsub.f32 1.5, %v483_v8 }
 0x18c   :  { %v1003_v13 = vpop.eup %663  ;;  %v1005_v50 = vadd.f32 1e-05, %v192_v10  ;;  %v1007_v18 = vadd.f32 1e-05, %v196_v11  ;;  %v212_v19 = vmul.f32 %v660_v36, %v211_v12 }
 0x18d   :  { %v1009_v52 = vpop.eup %665  ;;  %v248_v24 = vmul.f32 %v1003_v13, %v995_v32  ;;  %v485_v53 = vmul.f32 %v662_v1, %v484_v16  ;;  %vm254_vm13 = vweird.f32 %v1003_v13 }
 0x18e   :  { %v521_v29 = vmul.f32 %v1009_v52, %v997_v62  ;;  %667 = vrsqrt.f32 %v1005_v50  ;;  %v216_v31 = vsel %vm215_vm7, %v660_v36, %v212_v19  ;;  %vm527_vm14 = vweird.f32 %v1009_v52  ;;  %vm255_vm15 = vmor %vm253_vm12, %vm254_vm13 }
 0x18f   :  { %v249_v33 = vmul.f32 %v1003_v13, %v248_v24  ;;  %669 = vrsqrt.f32 %v1007_v18  ;;  %v287_v60 = vmul.f32 %v216_v31, %v882_v23  ;;  %v489_v40 = vsel %vm488_vm9, %v662_v1, %v485_v53  ;;  %vm528_vm1 = vmor %vm526_vm0, %vm527_vm14 }
 0x190   :  { %v522_v59 = vmul.f32 %v1009_v52, %v521_v29  ;;  %v560_v27 = vmul.f32 %v489_v40, %v879_v22  ;;  %v445_v0 = vpop.xlane.xlu1 %444  ;;  %vm223_vm2 = vweird.f32 %v1005_v50  ;;  %vm263_vm5 = vweird.f32 %v1007_v18 }
 0x191   :  { %v250_v39 = vmul.f32 0.5, %v249_v33  ;;  %v175_v45 = vpop.xlane.xlu0 %174  ;;  %v298_v26 = vmul.f32 %v1016_v28, %v287_v60  ;;  %v465_v23 = vmul.f32 %v445_v0, %v872_v14 }
 0x192   :  { %v523_v49 = vmul.f32 0.5, %v522_v59  ;;  %v193_v51 = vmul.f32 %v175_v45, %v874_v15  ;;  %v571_v35 = vmul.f32 %v1024_v21, %v560_v27 }
 0x193   :  { %v251_v54 = vsub.f32 1.5, %v250_v39  ;;  %v309_v22 = vadd.f32 %v1032_v37, %v298_v26  ;;  %v1052_v57 = vadd.f32 1e-05, %v465_v23 }
 0x194   :  { %v1048_v55 = vpop.eup %667  ;;  %v524_v56 = vsub.f32 1.5, %v523_v49  ;;  %v582_v36 = vadd.f32 %v1039_v44, %v571_v35  ;;  %v1060_v4 = vadd.f32 1e-05, %v193_v51 }
 0x195   :  { %v1054_v58 = vpop.eup %669  ;;  %v252_v1 = vmul.f32 %v1003_v13, %v251_v54  ;;  %v218_v2 = vmul.f32 %v1048_v55, %v1005_v50  ;;  %v317_v5 = vpack.c.bf16 %v309_v22, %v309_v22  ;;  %671 = vrsqrt.f32 %v1052_v57 }
 0x196   :  { %v525_v42 = vmul.f32 %v1009_v52, %v524_v56  ;;  %v258_v6 = vmul.f32 %v1054_v58, %v1007_v18  ;;  %v590_v7 = vpack.c.bf16 %v582_v36, %v582_v36  ;;  %673 = vrsqrt.f32 %v1060_v4 }
 0x197   :  { %v256_v43 = vsel %vm255_vm15, %v1003_v13, %v252_v1  ;;  %v219_v8 = vmul.f32 %v1048_v55, %v218_v2  ;;  %326 = vst.msk [vmem:[%s1278_s9] sm:$0xf] %vm325_vm10, %v317_v5  ;;  %v448_v11 = vpop.xlane.xlu2 %447  ;;  %vm224_vm3 = vweird.f32 %v1048_v55  ;;  %vm264_vm4 = vweird.f32 %v1054_v58 }
 0x198   :  { %v291_v32 = vmul.f32 %v256_v43, %v893_v20  ;;  %v529_v62 = vsel %vm528_vm1, %v1009_v52, %v525_v42  ;;  %v259_v10 = vmul.f32 %v1054_v58, %v258_v6  ;;  %599 = vst.msk [vmem:[%s1279_s10] sm:$0xf] %vm598_vm11, %v590_v7  ;;  %v187_v16 = vpop.xlane.xlu1 %186  ;;  %v466_v24 = vmul.f32 %v448_v11, %v872_v14  ;;  %vm225_vm6 = vmor %vm223_vm2, %vm224_vm3 }
 0x199   :  { %v564_v12 = vmul.f32 %v529_v62, %v896_v34  ;;  %v220_v13 = vmul.f32 0.5, %v219_v8  ;;  %v451_v19 = vpop.xlane.xlu0 %450  ;;  %v197_v53 = vmul.f32 %v187_v16, %v874_v15  ;;  %vm265_vm7 = vmor %vm263_vm5, %vm264_vm4  ;;  %vm496_vm8 = vweird.f32 %v1052_v57 }
 0x19a   :  { %v302_v20 = vmul.f32 %v1016_v28, %v291_v32  ;;  %v260_v52 = vmul.f32 0.5, %v259_v10  ;;  %v467_v34 = vmul.f32 %v451_v19, %v872_v14  ;;  %v1095_v40 = vadd.f32 1e-05, %v466_v24 }
 0x19b   :  { %v575_v29 = vmul.f32 %v1024_v21, %v564_v12  ;;  %v221_v31 = vsub.f32 1.5, %v220_v13  ;;  %v672_v59 = vpop.eup %671  ;;  %v1100_v0 = vadd.f32 1e-05, %v197_v53  ;;  %vm233_vm14 = vweird.f32 %v1060_v4 }
 0x19c   :  { %v313_v33 = vadd.f32 %v1032_v37, %v302_v20  ;;  %v261_v60 = vsub.f32 1.5, %v260_v52  ;;  %v491_v49 = vmul.f32 %v672_v59, %v1052_v57  ;;  %v1106_v23 = vadd.f32 1e-05, %v467_v34  ;;  %v674_v51 = vpop.eup %673 }
 0x19d   :  { %v586_v27 = vadd.f32 %v1039_v44, %v575_v29  ;;  %v222_v39 = vmul.f32 %v1048_v55, %v221_v31  ;;  %675 = vrsqrt.f32 %v1095_v40  ;;  %v228_v56 = vmul.f32 %v674_v51, %v1060_v4 }
 0x19e   :  { %v321_v45 = vpack.c.bf16 %v313_v33, %v313_v33  ;;  %v262_v26 = vmul.f32 %v1054_v58, %v261_v60  ;;  %v492_v22 = vmul.f32 %v672_v59, %v491_v49  ;;  %677 = vrsqrt.f32 %v1100_v0 }
 0x19f   :  { %v594_v35 = vpack.c.bf16 %v586_v27, %v586_v27  ;;  %v226_v54 = vsel %vm225_vm6, %v1048_v55, %v222_v39  ;;  %679 = vrsqrt.f32 %v1106_v23  ;;  %vm497_vm9 = vweird.f32 %v672_v59 }
 0x1a0   :  { %330 = vst.msk [vmem:[%s1278_s9 + $0x10] sm:$0xf] %vm325_vm10, %v321_v45  ;;  %v288_v50 = vmul.f32 %v226_v54, %v912_v48  ;;  %v266_v18 = vsel %vm265_vm7, %v1054_v58, %v262_v26  ;;  %v178_v36 = vpop.xlane.xlu1 %177  ;;  %v493_v5 = vmul.f32 0.5, %v492_v22  ;;  %v229_v48 = vmul.f32 %v674_v51, %v228_v56  ;;  %vm498_vm13 = vmor %vm496_vm8, %vm497_vm9 }
 0x1a1   :  { %603 = vst.msk [vmem:[%s1279_s10 + $0x10] sm:$0xf] %vm598_vm11, %v594_v35  ;;  %v292_v55 = vmul.f32 %v266_v18, %v909_v46  ;;  %v460_v1 = vpop.xlane.xlu0 %459  ;;  %v194_v42 = vmul.f32 %v178_v36, %v874_v15  ;;  %vm234_vm12 = vweird.f32 %v674_v51  ;;  %vm506_vm15 = vweird.f32 %v1095_v40 }
 0x1a2   :  { %v299_v2 = vmul.f32 %v1016_v28, %v288_v50  ;;  %v470_v6 = vmul.f32 %v460_v1, %v872_v14  ;;  %v494_v7 = vsub.f32 1.5, %v493_v5  ;;  %v230_v43 = vmul.f32 0.5, %v229_v48  ;;  %vm235_vm0 = vmor %vm233_vm14, %vm234_vm12 }
 0x1a3   :  { %v303_v58 = vmul.f32 %v1016_v28, %v292_v55  ;;  %v1132_v8 = vpop.eup %675  ;;  %v1135_v62 = vadd.f32 1e-05, %v194_v42  ;;  %vm273_vm1 = vweird.f32 %v1100_v0  ;;  %vm516_vm2 = vweird.f32 %v1106_v23 }
 0x1a4   :  { %v310_v46 = vadd.f32 %v1032_v37, %v299_v2  ;;  %v1137_v10 = vadd.f32 1e-05, %v470_v6  ;;  %v495_v12 = vmul.f32 %v672_v59, %v494_v7  ;;  %v231_v13 = vsub.f32 1.5, %v230_v43  ;;  %v1141_v19 = vpop.eup %677 }
 0x1a5   :  { %v314_v32 = vadd.f32 %v1032_v37, %v303_v58  ;;  %v501_v16 = vmul.f32 %v1132_v8, %v1095_v40  ;;  %681 = vrsqrt.f32 %v1135_v62  ;;  %v680_v52 = vpop.eup %679  ;;  %v268_v57 = vmul.f32 %v1141_v19, %v1100_v0 }
 0x1a6   :  { %v318_v11 = vpack.c.bf16 %v310_v46, %v310_v46  ;;  %v499_v24 = vsel %vm498_vm13, %v672_v59, %v495_v12  ;;  %v232_v53 = vmul.f32 %v674_v51, %v231_v13  ;;  %v511_v31 = vmul.f32 %v680_v52, %v1106_v23 }
 0x1a7   :  { %v322_v20 = vpack.c.bf16 %v314_v32, %v314_v32  ;;  %v502_v29 = vmul.f32 %v1132_v8, %v501_v16  ;;  %v561_v4 = vmul.f32 %v499_v24, %v927_v63  ;;  %v190_v34 = vpop.xlane.xlu2 %189  ;;  %v269_v27 = vmul.f32 %v1141_v19, %v268_v57 }
 0x1a8   :  { %327 = vst.msk [vmem:[%s1278_s9 + $0x4] sm:$0xf] %vm325_vm10, %v318_v11  ;;  %v463_v33 = vpop.xlane.xlu1 %462  ;;  %v236_v60 = vsel %vm235_vm0, %v674_v51, %v232_v53  ;;  %683 = vrsqrt.f32 %v1137_v10  ;;  %vm507_vm3 = vweird.f32 %v1132_v8  ;;  %v512_v45 = vmul.f32 %v680_v52, %v511_v31 }
 0x1a9   :  { %331 = vst.msk [vmem:[%s1278_s9 + $0x14] sm:$0xf] %vm325_vm10, %v322_v20  ;;  %v503_v59 = vmul.f32 0.5, %v502_v29  ;;  %v572_v39 = vmul.f32 %v1024_v21, %v561_v4  ;;  %v289_v63 = vmul.f32 %v236_v60, %v923_v61  ;;  %v270_v49 = vmul.f32 0.5, %v269_v27  ;;  %vm508_vm6 = vmor %vm506_vm15, %vm507_vm3 }
 0x1aa   :  { %v198_v35 = vmul.f32 %v190_v34, %v874_v15  ;;  %v471_v54 = vmul.f32 %v463_v33, %v872_v14  ;;  %vm274_vm4 = vweird.f32 %v1141_v19  ;;  %v513_v22 = vmul.f32 0.5, %v512_v45 }
 0x1ab   :  { %v504_v26 = vsub.f32 1.5, %v503_v59  ;;  %v682_v50 = vpop.eup %681  ;;  %v583_v51 = vadd.f32 %v1039_v44, %v572_v39  ;;  %v300_v18 = vmul.f32 %v1016_v28, %v289_v63  ;;  %v271_v61 = vsub.f32 1.5, %v270_v49  ;;  %vm275_vm7 = vmor %vm273_vm1, %vm274_vm4 }
 0x1ac   :  { %vm517_vm5 = vweird.f32 %v680_v52  ;;  %v238_v55 = vmul.f32 %v682_v50, %v1135_v62  ;;  %v514_v15 = vsub.f32 1.5, %v513_v22  ;;  %v1181_v2 = vadd.f32 1e-05, %v198_v35 }
 0x1ad   :  { %v505_v56 = vmul.f32 %v1132_v8, %v504_v26  ;;  %v591_v36 = vpack.c.bf16 %v583_v51, %v583_v51  ;;  %v311_v1 = vadd.f32 %v1032_v37, %v300_v18  ;;  %v272_v58 = vmul.f32 %v1141_v19, %v271_v61  ;;  %vm518_vm8 = vmor %vm516_vm2, %vm517_vm5 }
 0x1ae   :  { %v684_v5 = vpop.eup %683  ;;  %v239_v42 = vmul.f32 %v682_v50, %v238_v55  ;;  %v1185_v6 = vadd.f32 1e-05, %v471_v54  ;;  %v515_v7 = vmul.f32 %v680_v52, %v514_v15  ;;  %685 = vrsqrt.f32 %v1181_v2 }
 0x1af   :  { %v509_v48 = vsel %vm508_vm6, %v1132_v8, %v505_v56  ;;  %600 = vst.msk [vmem:[%s1279_s10 + $0x4] sm:$0xf] %vm598_vm11, %v591_v36  ;;  %v319_v46 = vpack.c.bf16 %v311_v1, %v311_v1  ;;  %v541_v43 = vmul.f32 %v684_v5, %v1137_v10  ;;  %v276_v8 = vsel %vm275_vm7, %v1141_v19, %v272_v58  ;;  %v457_v13 = vpop.xlane.xlu2 %456 }
 0x1b0   :  { %v562_v40 = vmul.f32 %v509_v48, %v941_v9  ;;  %v240_v32 = vmul.f32 0.5, %v239_v42  ;;  %v293_v0 = vmul.f32 %v276_v8, %v945_v47  ;;  %v519_v11 = vsel %vm518_vm8, %v680_v52, %v515_v7 }
 0x1b1   :  { %328 = vst.msk [vmem:[%s1278_s9 + $0x8] sm:$0xf] %vm325_vm10, %v319_v46  ;;  %v542_v12 = vmul.f32 %v684_v5, %v541_v43  ;;  %v563_v16 = vmul.f32 %v519_v11, %v934_v3  ;;  %vm244_vm9 = vweird.f32 %v682_v50  ;;  %687 = vrsqrt.f32 %v1185_v6 }
 0x1b2   :  { %v573_v9 = vmul.f32 %v1024_v21, %v562_v40  ;;  %v241_v19 = vsub.f32 1.5, %v240_v32  ;;  %v304_v20 = vmul.f32 %v1016_v28, %v293_v0  ;;  %vm243_vm12 = vweird.f32 %v1135_v62 }
 0x1b3   :  { %v543_v24 = vmul.f32 0.5, %v542_v12  ;;  %v574_v53 = vmul.f32 %v1024_v21, %v563_v16  ;;  %v469_v47 = vmul.f32 %v457_v13, %v872_v14  ;;  %vm245_vm13 = vmor %vm243_vm12, %vm244_vm9  ;;  %vm547_vm14 = vweird.f32 %v684_v5 }
 0x1b4   :  { %v584_v23 = vadd.f32 %v1039_v44, %v573_v9  ;;  %v242_v29 = vmul.f32 %v682_v50, %v241_v19  ;;  %v315_v57 = vadd.f32 %v1032_v37, %v304_v20  ;;  %v686_v4 = vpop.eup %685  ;;  %vm546_vm15 = vweird.f32 %v1137_v10 }
 0x1b5   :  { %v544_v3 = vsub.f32 1.5, %v543_v24  ;;  %v585_v31 = vadd.f32 %v1039_v44, %v574_v53  ;;  %v477_v33 = vadd.f32 1e-05, %v469_v47  ;;  %v278_v59 = vmul.f32 %v686_v4, %v1181_v2  ;;  %vm548_vm0 = vmor %vm546_vm15, %vm547_vm14 }
 0x1b6   :  { %v592_v52 = vpack.c.bf16 %v584_v23, %v584_v23  ;;  %v246_v34 = vsel %vm245_vm13, %v682_v50, %v242_v29  ;;  %v323_v62 = vpack.c.bf16 %v315_v57, %v315_v57  ;;  %vm284_vm1 = vweird.f32 %v686_v4 }
 0x1b7   :  { %v290_v14 = vmul.f32 %v246_v34, %v961_v25  ;;  %v545_v60 = vmul.f32 %v684_v5, %v544_v3  ;;  %v688_v27 = vpop.eup %687  ;;  %v593_v39 = vpack.c.bf16 %v585_v31, %v585_v31  ;;  %689 = vrsqrt.f32 %v477_v33 }
 0x1b8   :  { %601 = vst.msk [vmem:[%s1279_s10 + $0x8] sm:$0xf] %vm598_vm11, %v592_v52  ;;  %v279_v45 = vmul.f32 %v686_v4, %v278_v59  ;;  %v551_v26 = vmul.f32 %v688_v27, %v1185_v6  ;;  %vm283_vm2 = vweird.f32 %v1181_v2  ;;  %vm557_vm3 = vweird.f32 %v688_v27 }
 0x1b9   :  { %332 = vst.msk [vmem:[%s1278_s9 + $0x18] sm:$0xf] %vm325_vm10, %v323_v62  ;;  %v301_v10 = vmul.f32 %v1016_v28, %v290_v14  ;;  %v549_v63 = vsel %vm548_vm0, %v684_v5, %v545_v60  ;;  %vm285_vm4 = vmor %vm283_vm2, %vm284_vm1  ;;  %vm556_vm5 = vweird.f32 %v1185_v6  ;;  %vm536_vm8 = vweird.f32 %v477_v33 }
 0x1ba   :  { %602 = vst.msk [vmem:[%s1279_s10 + $0xc] sm:$0xf] %vm598_vm11, %v593_v39  ;;  %v566_v25 = vmul.f32 %v549_v63, %v955_v17  ;;  %v280_v35 = vmul.f32 0.5, %v279_v45  ;;  %v552_v54 = vmul.f32 %v688_v27, %v551_v26  ;;  %vm558_vm6 = vmor %vm556_vm5, %vm557_vm3 }
 0x1bb   :  { %v312_v49 = vadd.f32 %v1032_v37, %v301_v10 }
 0x1bc   :  { %v577_v50 = vmul.f32 %v1024_v21, %v566_v25  ;;  %v281_v18 = vsub.f32 1.5, %v280_v35  ;;  %v553_v22 = vmul.f32 0.5, %v552_v54 }
 0x1bd   :  { %v320_v51 = vpack.c.bf16 %v312_v49, %v312_v49  ;;  %v690_v56 = vpop.eup %689 }
 0x1be   :  { %v588_v61 = vadd.f32 %v1039_v44, %v577_v50  ;;  %v282_v17 = vmul.f32 %v686_v4, %v281_v18  ;;  %v554_v55 = vsub.f32 1.5, %v553_v22  ;;  %v531_v36 = vmul.f32 %v690_v56, %v477_v33 }
 0x1bf   :  { %329 = vst.msk [vmem:[%s1278_s9 + $0xc] sm:$0xf] %vm325_vm10, %v320_v51  ;;  %vm537_vm7 = vweird.f32 %v690_v56 }
 0x1c0   :  { %v596_v1 = vpack.c.bf16 %v588_v61, %v588_v61  ;;  %v286_v15 = vsel %vm285_vm4, %v686_v4, %v282_v17  ;;  %v555_v5 = vmul.f32 %v688_v27, %v554_v55  ;;  %v532_v48 = vmul.f32 %v690_v56, %v531_v36  ;;  %vm538_vm9 = vmor %vm536_vm8, %vm537_vm7 }
 0x1c1   :  { %v294_v2 = vmul.f32 %v286_v15, %v977_v38 }
 0x1c2   :  { %605 = vst.msk [vmem:[%s1279_s10 + $0x18] sm:$0xf] %vm598_vm11, %v596_v1  ;;  %v559_v58 = vsel %vm558_vm6, %v688_v27, %v555_v5  ;;  %v533_v42 = vmul.f32 0.5, %v532_v48 }
 0x1c3   :  { %v305_v46 = vmul.f32 %v1016_v28, %v294_v2  ;;  %v567_v40 = vmul.f32 %v559_v58, %v969_v30 }
 0x1c4   :  { %v534_v7 = vsub.f32 1.5, %v533_v42 }
 0x1c5   :  { %v316_v43 = vadd.f32 %v1032_v37, %v305_v46  ;;  %v578_v6 = vmul.f32 %v1024_v21, %v567_v40 }
 0x1c6   :  { %v535_v8 = vmul.f32 %v690_v56, %v534_v7 }
 0x1c7   :  { %v324_v32 = vpack.c.bf16 %v316_v43, %v316_v43  ;;  %v589_v9 = vadd.f32 %v1039_v44, %v578_v6 }
 0x1c8   :  { %v539_v38 = vsel %vm538_vm9, %v690_v56, %v535_v8 }
 0x1c9   :  { %333 = vst.msk [vmem:[%s1278_s9 + $0x1c] sm:$0xf] %vm325_vm10, %v324_v32  ;;  %v597_v28 = vpack.c.bf16 %v589_v9, %v589_v9  ;;  %v565_v30 = vmul.f32 %v539_v38, %v984_v41 }
 0x1cb   :  { %606 = vst.msk [vmem:[%s1279_s10 + $0x1c] sm:$0xf] %vm598_vm11, %v597_v28  ;;  %v576_v37 = vmul.f32 %v1024_v21, %v565_v30 }
 0x1cd   :  { %v587_v0 = vadd.f32 %v1039_v44, %v576_v37 }
 0x1cf   :  { %v595_v11 = vpack.c.bf16 %v587_v0, %v587_v0 }
 0x1d1   :  { %604 = vst.msk [vmem:[%s1279_s10 + $0x14] sm:$0xf] %vm598_vm11, %v595_v11 }

</bundles_post_ra>
